<compile_context>
chip_gen: v6e
topology: v6e:2x2x1
jax: 0.10.0
libtpu: 0.0.40
codegen_flags: <defaults>
</compile_context>

<pallas_src>
import jax
import jax.numpy as jnp
from jax.experimental import pallas as pl
from jax.experimental.pallas import tpu as pltpu

LANE = 128


def mlp_kernel(x_ref, w1_ref, b1_ref, w2_ref, b2_ref, o_ref):
    # Layer 1 (Linear, in_features = 1): K=1 contraction is a degenerate matmul, so
    # compute it as a VPU broadcast outer-product:  h[j, b] = w1[j] * x[b] + b1[j]
    x = x_ref[...]                              # [1, tb]   batch on the lane axis
    h = w1_ref[...] * x + b1_ref[...]           # [H, 1] * [1, tb] -> [H, tb]
    h = jnp.maximum(h, 0.0)                     # ReLU on the VPU (f32)

    # Layer 2 (Linear, out_features = 1): N=1 matmul would use 1/128 of the MXU, so do
    # VPU multiply + sublane reduction (XLU):  y[b] = sum_j h[j, b] * w2[j] + b2
    y = jnp.sum(h * w2_ref[...], axis=0, keepdims=True) + b2_ref[...]   # [1, tb]

    # Lane-dense store: tb is a multiple of 128 -> unmasked vst (no vst.msk epilogue).
    o_ref[...] = y.astype(o_ref.dtype)


def net_forward(x, w1, b1, w2, b2, *, block_batch=1024):
    """Forward pass of Net: y = relu(x @ W1 + b1) @ W2 + b2.

    Specialized to the shapes the module's data implies (n_feature == 1, n_output == 1);
    batch lives on the 128-lane axis so all loads/stores are lane-dense and no MXU issue
    is needed. block_batch=1024 keeps per-step VMEM tiny (fits v7x's 64 MiB budget easily).
    """
    batch, n_feature = x.shape
    n_hidden = w1.shape[1]
    n_output = w2.shape[1]
    if n_feature != 1 or n_output != 1:
        # TODO(synk): general (n_feature>1 / n_output>1) path would use MXU jnp.dot tiles.
        raise NotImplementedError("kernel specialized to Net's n_feature=1, n_output=1")

    # Re-layout: batch -> lanes, weights as [H, 1] columns for VPU broadcasting.
    x_row = x.reshape(1, batch)
    w1_col = w1.reshape(n_hidden, 1)
    b1_col = b1.reshape(n_hidden, 1)
    w2_col = w2.reshape(n_hidden, 1)
    b2_s = b2.reshape(1, 1)

    # Batch (lane) tile: multiple of 128 for unmasked vld/vst, capped at block_batch.
    tb = min(block_batch, pl.cdiv(batch, LANE) * LANE)
    padded = pl.cdiv(batch, tb) * tb
    if padded != batch:
        x_row = jnp.pad(x_row, ((0, 0), (0, padded - batch)))

    out_row = pl.pallas_call(
        mlp_kernel,
        out_shape=jax.ShapeDtypeStruct((1, padded), x.dtype),
        grid_spec=pltpu.PrefetchScalarGridSpec(
            num_scalar_prefetch=0,
            grid=(padded // tb,),
            in_specs=[
                pl.BlockSpec((1, tb), lambda i: (0, i)),        # x: streamed over batch
                pl.BlockSpec((n_hidden, 1), lambda i: (0, 0)),  # w1: VMEM-resident
                pl.BlockSpec((n_hidden, 1), lambda i: (0, 0)),  # b1: VMEM-resident
                pl.BlockSpec((n_hidden, 1), lambda i: (0, 0)),  # w2: VMEM-resident
                pl.BlockSpec((1, 1), lambda i: (0, 0)),         # b2: VMEM-resident
            ],
            out_specs=pl.BlockSpec((1, tb), lambda i: (0, i)),
        ),
        compiler_params=pltpu.CompilerParams(
            dimension_semantics=("parallel",),  # batch tiles independent (megacore-shardable)
        ),
    )(x_row, w1_col, b1_col, w2_col, b2_s)

    return out_row[:, :batch].reshape(batch, n_output)


if __name__ == "__main__":
    # Shapes implied by the original script: x = linspace(-1, 1, 1000).unsqueeze(1),
    # Net(n_feature=1, n_hidden=32, n_output=1).
    batch, n_feature, n_hidden, n_output = 1000, 1, 32, 1

    key = jax.random.PRNGKey(0)
    kw1, kb1, kw2, kb2 = jax.random.split(key, 4)

    # Deterministic input matching torch.linspace(-1, 1, 1000).unsqueeze(1)
    x = jnp.linspace(-1.0, 1.0, batch, dtype=jnp.float32).reshape(batch, n_feature)

    # PyTorch-Linear-like uniform init (bound = 1/sqrt(fan_in)).
    bound1 = 1.0 / (n_feature ** 0.5)
    bound2 = 1.0 / (n_hidden ** 0.5)
    w1 = jax.random.uniform(kw1, (n_feature, n_hidden), jnp.float32, -bound1, bound1)
    b1 = jax.random.uniform(kb1, (n_hidden,), jnp.float32, -bound1, bound1)
    w2 = jax.random.uniform(kw2, (n_hidden, n_output), jnp.float32, -bound2, bound2)
    b2 = jax.random.uniform(kb2, (n_output,), jnp.float32, -bound2, bound2)

    out = jax.block_until_ready(net_forward(x, w1, b1, w2, b2))

    # Pure-JAX reference.
    ref = jnp.maximum(x @ w1 + b1, 0.0) @ w2 + b2
    assert out.shape == (batch, n_output)
    assert jnp.allclose(out, ref, atol=1e-5, rtol=1e-5)

    print("KERNEL_OK")
</pallas_src>

<mosaic_0001>
module attributes {stable_mosaic.version = 11 : i64} {
  func.func @mlp_kernel(%arg0: i32, %arg1: memref<1x1024xf32, #tpu.memory_space<vmem>>, %arg2: memref<32x1xf32, #tpu.memory_space<vmem>>, %arg3: memref<32x1xf32, #tpu.memory_space<vmem>>, %arg4: memref<32x1xf32, #tpu.memory_space<vmem>>, %arg5: memref<1x1xf32, #tpu.memory_space<vmem>>, %arg6: memref<1x1024xf32, #tpu.memory_space<vmem>>) attributes {dimension_semantics = [#tpu.dimension_semantics<parallel>], iteration_bounds = array<i64: 1>, scalar_prefetch = 0 : i64, scratch_operands = 0 : i64, tpu.core_type = #tpu.core_type<tc>, window_params = [{transform_indices = @transform_0, window_bounds = array<i64: 1, 1024>}, {pipeline_mode = #tpu.pipeline_mode<synchronous>, transform_indices = @transform_1, window_bounds = array<i64: 32, 1>}, {pipeline_mode = #tpu.pipeline_mode<synchronous>, transform_indices = @transform_2, window_bounds = array<i64: 32, 1>}, {pipeline_mode = #tpu.pipeline_mode<synchronous>, transform_indices = @transform_3, window_bounds = array<i64: 32, 1>}, {pipeline_mode = #tpu.pipeline_mode<synchronous>, transform_indices = @transform_4, window_bounds = array<i64: 1, 1>}, {transform_indices = @transform_5, window_bounds = array<i64: 1, 1024>}]} {
    %c0 = arith.constant 0 : index
    %c0_0 = arith.constant 0 : index
    %0 = vector.load %arg1[%c0, %c0_0] : memref<1x1024xf32, #tpu.memory_space<vmem>>, vector<1x1024xf32>
    %c0_1 = arith.constant 0 : index
    %c0_2 = arith.constant 0 : index
    %1 = vector.load %arg2[%c0_1, %c0_2] : memref<32x1xf32, #tpu.memory_space<vmem>>, vector<32x1xf32>
    %2 = vector.broadcast %1 : vector<32x1xf32> to vector<32x1024xf32>
    %3 = vector.broadcast %0 : vector<1x1024xf32> to vector<32x1024xf32>
    %4 = arith.mulf %2, %3 : vector<32x1024xf32>
    %c0_3 = arith.constant 0 : index
    %c0_4 = arith.constant 0 : index
    %5 = vector.load %arg3[%c0_3, %c0_4] : memref<32x1xf32, #tpu.memory_space<vmem>>, vector<32x1xf32>
    %6 = vector.broadcast %5 : vector<32x1xf32> to vector<32x1024xf32>
    %7 = arith.addf %4, %6 : vector<32x1024xf32>
    %cst = arith.constant 0.000000e+00 : f32
    %8 = vector.broadcast %cst : f32 to vector<32x1024xf32>
    %9 = arith.maximumf %7, %8 : vector<32x1024xf32>
    %c0_5 = arith.constant 0 : index
    %c0_6 = arith.constant 0 : index
    %10 = vector.load %arg4[%c0_5, %c0_6] : memref<32x1xf32, #tpu.memory_space<vmem>>, vector<32x1xf32>
    %11 = vector.broadcast %10 : vector<32x1xf32> to vector<32x1024xf32>
    %12 = arith.mulf %9, %11 : vector<32x1024xf32>
    %cst_7 = arith.constant dense<0.000000e+00> : vector<1024xf32>
    %13 = vector.multi_reduction <add>, %12, %cst_7 [0] : vector<32x1024xf32> to vector<1024xf32>
    %14 = vector.shape_cast %13 : vector<1024xf32> to vector<1x1024xf32>
    %c0_8 = arith.constant 0 : index
    %c0_9 = arith.constant 0 : index
    %15 = vector.load %arg5[%c0_8, %c0_9] : memref<1x1xf32, #tpu.memory_space<vmem>>, vector<1x1xf32>
    %16 = vector.broadcast %15 : vector<1x1xf32> to vector<1x1024xf32>
    %17 = arith.addf %14, %16 : vector<1x1024xf32>
    %c0_10 = arith.constant 0 : index
    %c0_11 = arith.constant 0 : index
    %18 = vector.load %arg6[%c0_10, %c0_11] : memref<1x1024xf32, #tpu.memory_space<vmem>>, vector<1x1024xf32>
    tpu.vector_store %arg6[%c0_10, %c0_11], %17 {strides = array<i32>} : memref<1x1024xf32, #tpu.memory_space<vmem>>, vector<1x1024xf32>,
    return
  }
  func.func @transform_0(%arg0: i32) -> (i32, i32) {
    %c0_i32 = arith.constant 0 : i32
    %c0_i32_0 = arith.constant 0 : i32
    return %c0_i32, %arg0 : i32, i32
  }
  func.func @transform_1(%arg0: i32) -> (i32, i32) {
    %c0_i32 = arith.constant 0 : i32
    %c0_i32_0 = arith.constant 0 : i32
    %c0_i32_1 = arith.constant 0 : i32
    return %c0_i32, %c0_i32_0 : i32, i32
  }
  func.func @transform_2(%arg0: i32) -> (i32, i32) {
    %c0_i32 = arith.constant 0 : i32
    %c0_i32_0 = arith.constant 0 : i32
    %c0_i32_1 = arith.constant 0 : i32
    return %c0_i32, %c0_i32_0 : i32, i32
  }
  func.func @transform_3(%arg0: i32) -> (i32, i32) {
    %c0_i32 = arith.constant 0 : i32
    %c0_i32_0 = arith.constant 0 : i32
    %c0_i32_1 = arith.constant 0 : i32
    return %c0_i32, %c0_i32_0 : i32, i32
  }
  func.func @transform_4(%arg0: i32) -> (i32, i32) {
    %c0_i32 = arith.constant 0 : i32
    %c0_i32_0 = arith.constant 0 : i32
    %c0_i32_1 = arith.constant 0 : i32
    return %c0_i32, %c0_i32_0 : i32, i32
  }
  func.func @transform_5(%arg0: i32) -> (i32, i32) {
    %c0_i32 = arith.constant 0 : i32
    %c0_i32_0 = arith.constant 0 : i32
    return %c0_i32, %arg0 : i32, i32
  }
}

</mosaic_0001>

<bundles_post_ra>
// kernel: tpu_custom_call.1
= control target key start
LH: loop header
LB: loop body
LE: loop exit
PB: predicated region body
PF: predicated region fallthrough
CT: control target
= control target key end

     0   :  { %s679_s0 = inlined_call_operand.vmem [shape: f32[1,1024], index: 0, kind: input, shape index: {}]   ;;  %s680_s1 = inlined_call_operand.vmem [shape: f32[32,1], index: 1, kind: input, shape index: {}]   ;;  %s681_s2 = inlined_call_operand.vmem [shape: f32[32,1], index: 2, kind: input, shape index: {}]   ;;  %s682_s3 = inlined_call_operand.vmem [shape: f32[32,1], index: 3, kind: input, shape index: {}]   ;;  %s683_s4 = inlined_call_operand.<no memory space> [shape: f32[1,1], index: 4, kind: input, shape index: {}]   ;;  %s684_s5 = inlined_call_operand.hbm [shape: f32[1,1024], index: 5, kind: output, shape index: {}]  }
   0x1   :  { %v10_v0 = vstv %s683_s4 }
   0x2   :  { %11 = vst [vmem:[#allocation2] sm:$0x1] %v10_v0 }
   0x3   :  { %v26_v1 = vld [vmem:[%s680_s1 + $0x10] sm:$0xff]  ;;  %v24_v2 = vld [vmem:[%s680_s1] sm:$0xff]  ;;  %v455_v3 = vmov 0   ;;  %v25_v5 = vld [vmem:[%s680_s1 + $0x8] sm:$0xff] }
   0x4   :  { %432 = vset.pattern.permute.xlu1 %v455_v3  ;;  %431 = vset.pattern.permute.xlu0 %v455_v3  ;;  %v121_v4 = vld [vmem:[%s681_s2] sm:$0xff] }
   0x5   :  { %40 = vperm.xlu1 %432, %v26_v1   ;;  %30 = vperm.xlu0 %431, %v24_v2  }
   0x6   :  { %12 = vsyncpa [#allocation4], 0  ;;  %v27_v6 = vld [vmem:[%s680_s1 + $0x18] sm:$0xff]  ;;  %v122_v7 = vld [vmem:[%s681_s2 + $0x8] sm:$0xff]  ;;  %v49_v15 = vlaneseq }
   0x7   :  { %v124_v8 = vld [vmem:[%s681_s2 + $0x18] sm:$0xff]  ;;  %v123_v9 = vld [vmem:[%s681_s2 + $0x10] sm:$0xff]  ;;  %v210_v10 = vld [vmem:[%s682_s3 + $0x8] sm:$0xff] }
   0x8   :  { %v209_v11 = vld [vmem:[%s682_s3] sm:$0xff]  ;;  %v212_v12 = vld [vmem:[%s682_s3 + $0x18] sm:$0xff]  ;;  %v211_v13 = vld [vmem:[%s682_s3 + $0x10] sm:$0xff]  ;;  %v527_v16 = vshrl.u32 %v49_v15, 7 }
   0x9   :  { %127 = vperm.xlu1 %432, %v121_v4   ;;  %35 = vperm.xlu0 %431, %v25_v5   ;;  %v337_v14 = vld [vmem:[#allocation2] sm:$0x1] }
   0xa   :  { %v55_v17 = vsub.s32 1, %v527_v16  ;;  %v59_v18 = vsub.s32 2, %v527_v16  ;;  %v63_v19 = vsub.s32 3, %v527_v16  ;;  %v67_v20 = vsub.s32 4, %v527_v16  ;;  %v23_v24 = vld [vmem:[%s679_s0] sm:$0xff]  ;;  %s457_s0 = smov [#allocation3]  }
   0xb   :  { %v71_v21 = vsub.s32 5, %v527_v16  ;;  %v75_v22 = vsub.s32 6, %v527_v16  ;;  %v79_v23 = vsub.s32 7, %v527_v16  ;;  %v51_v25 = vsub.s32 0, %v527_v16  ;;  %s420_s17 = sshll.u32 %s457_s0, 4  ;;  %s421_s17 = int_to_ptr.vmem [resolvable:$true] %s420_s17 }
   0xc   :  { %v56_v26 = vrot.slane %v23_v24, %v55_v17  ;;  %v60_v27 = vrot.slane %v23_v24, %v59_v18  ;;  %v64_v28 = vrot.slane %v23_v24, %v63_v19  ;;  %v68_v29 = vrot.slane %v23_v24, %v67_v20  ;;  %s433_s18 = scalar_lea.vmem %s421_s17, 128  ;;  %p438_p1 = scmp.lt.s32.totalorder %s421_s17, %s421_s17 }
   0xd   :  { %45 = vperm.xlu1 %432, %v27_v6   ;;  %132 = vperm.xlu0 %431, %v122_v7   ;;  %v72_v31 = vrot.slane %v23_v24, %v71_v21  ;;  %v76_v32 = vrot.slane %v23_v24, %v75_v22  ;;  %v80_v33 = vrot.slane %v23_v24, %v79_v23  ;;  %p434_p0 = scmp.ne.s32.totalorder %s421_s17, %s433_s18  ;;  %p439_p2 = scmp.lt.s32.totalorder %s433_s18, %s433_s18 }
   0xe   :  { %v542_v35 = vrot.slane %v23_v24, %v51_v25 }
   0xf   :  { %p440_p3 = por %p439_p2, %p438_p1 }
  0x11   :  { %142 = vperm.xlu1 %432, %v124_v8   ;;  %137 = vperm.xlu0 %431, %v123_v9   ;;  %p441_p4 = pnand %p440_p3, %p434_p0 }
  0x15   :  { %220 = vperm.xlu1 %432, %v210_v10   ;;  %215 = vperm.xlu0 %431, %v209_v11  }
  0x19   :  { %230 = vperm.xlu1 %432, %v212_v12   ;;  %225 = vperm.xlu0 %431, %v211_v13  }
  0x1d   :  { %340 = vperm.xlu0 %431, %v337_v14  }
  0x80   :  { %v41_v30 = vpop.permute.xlu1 %40  ;;  %v31_v34 = vpop.permute.xlu0 %30 }
  0x81   :  { %v106_v36 = vmul.f32 %v56_v26, %v41_v30  ;;  %v544_v37 = vmul.f32 %v60_v27, %v41_v30  ;;  %v546_v38 = vmul.f32 %v64_v28, %v41_v30  ;;  %v548_v39 = vmul.f32 %v68_v29, %v41_v30 }
  0x82   :  { %v550_v40 = vmul.f32 %v72_v31, %v41_v30  ;;  %v552_v41 = vmul.f32 %v76_v32, %v41_v30  ;;  %v554_v42 = vmul.f32 %v80_v33, %v41_v30  ;;  %v90_v43 = vmul.f32 %v56_v26, %v31_v34 }
  0x83   :  { %v91_v44 = vmul.f32 %v60_v27, %v31_v34  ;;  %v92_v45 = vmul.f32 %v64_v28, %v31_v34  ;;  %v93_v46 = vmul.f32 %v68_v29, %v31_v34  ;;  %v94_v47 = vmul.f32 %v72_v31, %v31_v34 }
  0x84   :  { %v95_v48 = vmul.f32 %v76_v32, %v31_v34  ;;  %v96_v49 = vmul.f32 %v80_v33, %v31_v34  ;;  %v556_v50 = vpop.permute.xlu1 %127  ;;  %v558_v51 = vpop.permute.xlu0 %35  ;;  %v561_v52 = vmul.f32 %v542_v35, %v31_v34  ;;  %v585_v60 = vmul.f32 %v542_v35, %v41_v30 }
  0x85   :  { %v564_v53 = vadd.f32 %v556_v50, %v90_v43  ;;  %v567_v54 = vadd.f32 %v556_v50, %v91_v44  ;;  %v570_v55 = vadd.f32 %v556_v50, %v92_v45  ;;  %v573_v56 = vadd.f32 %v556_v50, %v93_v46 }
  0x86   :  { %v576_v57 = vadd.f32 %v556_v50, %v94_v47  ;;  %v579_v58 = vadd.f32 %v556_v50, %v95_v48  ;;  %v582_v59 = vadd.f32 %v556_v50, %v96_v49  ;;  %v98_v0 = vmul.f32 %v56_v26, %v558_v51 }
  0x87   :  { %v178_v61 = vmax.f32 %v564_v53, 0.0  ;;  %v179_v62 = vmax.f32 %v567_v54, 0.0  ;;  %v180_v63 = vmax.f32 %v570_v55, 0.0  ;;  %v181_v1 = vmax.f32 %v573_v56, 0.0 }
  0x88   :  { %v182_v2 = vmax.f32 %v576_v57, 0.0  ;;  %v183_v3 = vmax.f32 %v579_v58, 0.0  ;;  %v184_v4 = vmax.f32 %v582_v59, 0.0  ;;  %v595_v5 = vpop.permute.xlu1 %45  ;;  %v597_v6 = vpop.permute.xlu0 %132  ;;  %v99_v7 = vmul.f32 %v60_v27, %v558_v51 }
  0x89   :  { %v100_v8 = vmul.f32 %v64_v28, %v558_v51  ;;  %v101_v9 = vmul.f32 %v68_v29, %v558_v51  ;;  %v102_v10 = vmul.f32 %v72_v31, %v558_v51  ;;  %v103_v11 = vmul.f32 %v76_v32, %v558_v51 }
  0x8a   :  { %v104_v12 = vmul.f32 %v80_v33, %v558_v51  ;;  %v114_v13 = vmul.f32 %v56_v26, %v595_v5  ;;  %v115_v14 = vmul.f32 %v60_v27, %v595_v5  ;;  %v116_v15 = vmul.f32 %v64_v28, %v595_v5 }
  0x8b   :  { %v117_v17 = vmul.f32 %v68_v29, %v595_v5  ;;  %v118_v18 = vmul.f32 %v72_v31, %v595_v5  ;;  %v119_v19 = vmul.f32 %v76_v32, %v595_v5  ;;  %v154_v20 = vadd.f32 %v597_v6, %v98_v0 }
  0x8c   :  { %v155_v21 = vadd.f32 %v597_v6, %v99_v7  ;;  %v156_v22 = vadd.f32 %v597_v6, %v100_v8  ;;  %v157_v23 = vadd.f32 %v597_v6, %v101_v9  ;;  %v615_v24 = vpop.permute.xlu1 %142  ;;  %v617_v26 = vpop.permute.xlu0 %137  ;;  %v158_v27 = vadd.f32 %v597_v6, %v102_v10 }
  0x8d   :  { %v159_v28 = vadd.f32 %v597_v6, %v103_v11  ;;  %v160_v29 = vadd.f32 %v597_v6, %v104_v12  ;;  %v162_v30 = vadd.f32 %v617_v26, %v106_v36  ;;  %v120_v31 = vmul.f32 %v80_v33, %v595_v5 }
  0x8e   :  { %v186_v32 = vmax.f32 %v154_v20, 0.0  ;;  %v187_v34 = vmax.f32 %v155_v21, 0.0  ;;  %v188_v43 = vmax.f32 %v156_v22, 0.0  ;;  %v189_v44 = vmax.f32 %v157_v23, 0.0 }
  0x8f   :  { %v190_v45 = vmax.f32 %v158_v27, 0.0  ;;  %v191_v46 = vmax.f32 %v159_v28, 0.0  ;;  %v163_v47 = vadd.f32 %v617_v26, %v544_v37  ;;  %v164_v48 = vadd.f32 %v617_v26, %v546_v38 }
  0x90   :  { %v165_v49 = vadd.f32 %v617_v26, %v548_v39  ;;  %v166_v36 = vadd.f32 %v617_v26, %v550_v40  ;;  %v167_v33 = vadd.f32 %v617_v26, %v552_v41  ;;  %v634_v53 = vpop.permute.xlu1 %220  ;;  %v192_v54 = vmax.f32 %v160_v29, 0.0  ;;  %v638_v57 = vpop.permute.xlu0 %215 }
  0x91   :  { %v168_v55 = vadd.f32 %v617_v26, %v554_v42  ;;  %v194_v56 = vmax.f32 %v162_v30, 0.0  ;;  %v195_v37 = vmax.f32 %v163_v47, 0.0  ;;  %v196_v38 = vmax.f32 %v164_v48, 0.0 }
  0x92   :  { %v197_v58 = vmax.f32 %v165_v49, 0.0  ;;  %v198_v59 = vmax.f32 %v166_v36, 0.0  ;;  %v242_v39 = vmul.f32 %v634_v53, %v186_v32  ;;  %v199_v0 = vmax.f32 %v167_v33, 0.0 }
  0x93   :  { %v243_v40 = vmul.f32 %v634_v53, %v187_v34  ;;  %v244_v41 = vmul.f32 %v634_v53, %v188_v43  ;;  %v245_v7 = vmul.f32 %v634_v53, %v189_v44  ;;  %v200_v8 = vmax.f32 %v168_v55, 0.0 }
  0x94   :  { %v246_v9 = vmul.f32 %v634_v53, %v190_v45  ;;  %v247_v42 = vmul.f32 %v634_v53, %v191_v46  ;;  %v234_v10 = vmul.f32 %v638_v57, %v178_v61  ;;  %v235_v11 = vmul.f32 %v638_v57, %v179_v62  ;;  %v226_v43 = vpop.permute.xlu0 %225 }
  0x95   :  { %v236_v12 = vmul.f32 %v638_v57, %v180_v63  ;;  %v237_v20 = vmul.f32 %v638_v57, %v181_v1  ;;  %v238_v21 = vmul.f32 %v638_v57, %v182_v2  ;;  %v248_v22 = vmul.f32 %v634_v53, %v192_v54  ;;  %v231_v2 = vpop.permute.xlu1 %230 }
  0x96   :  { %v239_v23 = vmul.f32 %v638_v57, %v183_v3  ;;  %v240_v27 = vmul.f32 %v638_v57, %v184_v4  ;;  %v170_v28 = vadd.f32 %v615_v24, %v114_v13  ;;  %v274_v29 = vadd.f32 %v242_v39, %v234_v10 }
  0x97   :  { %v283_v30 = vadd.f32 %v243_v40, %v235_v11  ;;  %v292_v32 = vadd.f32 %v244_v41, %v236_v12  ;;  %v301_v61 = vadd.f32 %v245_v7, %v237_v20  ;;  %v310_v34 = vadd.f32 %v246_v9, %v238_v21 }
  0x98   :  { %v319_v62 = vadd.f32 %v247_v42, %v239_v23  ;;  %v171_v63 = vadd.f32 %v615_v24, %v115_v14  ;;  %v172_v1 = vadd.f32 %v615_v24, %v116_v15  ;;  %v173_v44 = vadd.f32 %v615_v24, %v117_v17 }
  0x99   :  { %v174_v3 = vadd.f32 %v615_v24, %v118_v18  ;;  %v175_v4 = vadd.f32 %v615_v24, %v119_v19  ;;  %v176_v13 = vadd.f32 %v615_v24, %v120_v31  ;;  %v328_v45 = vadd.f32 %v248_v22, %v240_v27 }
  0x9a   :  { %v202_v46 = vmax.f32 %v170_v28, 0.0  ;;  %v203_v47 = vmax.f32 %v171_v63, 0.0  ;;  %v204_v48 = vmax.f32 %v172_v1, 0.0  ;;  %v205_v49 = vmax.f32 %v173_v44, 0.0 }
  0x9b   :  { %v206_v36 = vmax.f32 %v174_v3, 0.0  ;;  %v207_v33 = vmax.f32 %v175_v4, 0.0  ;;  %v250_v14 = vmul.f32 %v226_v43, %v194_v56  ;;  %v208_v54 = vmax.f32 %v176_v13, 0.0 }
  0x9c   :  { %v258_v15 = vmul.f32 %v231_v2, %v202_v46  ;;  %v259_v55 = vmul.f32 %v231_v2, %v203_v47  ;;  %v251_v39 = vmul.f32 %v226_v43, %v195_v37  ;;  %v260_v40 = vmul.f32 %v231_v2, %v204_v48 }
  0x9d   :  { %v261_v17 = vmul.f32 %v231_v2, %v205_v49  ;;  %v262_v41 = vmul.f32 %v231_v2, %v206_v36  ;;  %v263_v18 = vmul.f32 %v231_v2, %v207_v33  ;;  %v252_v7 = vmul.f32 %v226_v43, %v196_v38 }
  0x9e   :  { %v253_v19 = vmul.f32 %v226_v43, %v197_v58  ;;  %v254_v9 = vmul.f32 %v226_v43, %v198_v59  ;;  %v255_v31 = vmul.f32 %v226_v43, %v199_v0  ;;  %v256_v42 = vmul.f32 %v226_v43, %v200_v8 }
  0x9f   :  { %v275_v10 = vadd.f32 %v274_v29, %v250_v14  ;;  %v284_v11 = vadd.f32 %v283_v30, %v251_v39  ;;  %v97_v12 = vmul.f32 %v542_v35, %v558_v51  ;;  %v264_v20 = vmul.f32 %v231_v2, %v208_v54 }
  0xa0   :  { %v293_v56 = vadd.f32 %v292_v32, %v252_v7  ;;  %v302_v21 = vadd.f32 %v301_v61, %v253_v19  ;;  %v311_v22 = vadd.f32 %v310_v34, %v254_v9  ;;  %v320_v23 = vadd.f32 %v319_v62, %v255_v31  ;;  %v341_v7 = vpop.permute.xlu0 %340 }
  0xa1   :  { %v113_v37 = vmul.f32 %v542_v35, %v595_v5  ;;  %v145_v38 = vadd.f32 %v556_v50, %v561_v52  ;;  %v153_v58 = vadd.f32 %v597_v6, %v97_v12  ;;  %v329_v59 = vadd.f32 %v328_v45, %v256_v42 }
  0xa2   :  { %v161_v0 = vadd.f32 %v617_v26, %v585_v60  ;;  %v276_v8 = vadd.f32 %v275_v10, %v258_v15  ;;  %v285_v27 = vadd.f32 %v284_v11, %v259_v55  ;;  %v294_v30 = vadd.f32 %v293_v56, %v260_v40 }
  0xa3   :  { %v169_v51 = vadd.f32 %v615_v24, %v113_v37  ;;  %v177_v28 = vmax.f32 %v145_v38, 0.0  ;;  %v185_v29 = vmax.f32 %v153_v58, 0.0  ;;  %v303_v35 = vadd.f32 %v302_v21, %v261_v17 }
  0xa4   :  { %v193_v32 = vmax.f32 %v161_v0, 0.0  ;;  %v277_v61 = vrot.slane %v276_v8, 4  ;;  %v286_v34 = vrot.slane %v285_v27, 4  ;;  %v295_v6 = vrot.slane %v294_v30, 4 }
  0xa5   :  { %v201_v5 = vmax.f32 %v169_v51, 0.0  ;;  %v233_v50 = vmul.f32 %v638_v57, %v177_v28  ;;  %v241_v52 = vmul.f32 %v634_v53, %v185_v29  ;;  %v304_v26 = vrot.slane %v303_v35, 4 }
  0xa6   :  { %v249_v62 = vmul.f32 %v226_v43, %v193_v32  ;;  %v278_v63 = vadd.f32 %v277_v61, %v276_v8  ;;  %v287_v60 = vadd.f32 %v286_v34, %v285_v27  ;;  %v296_v24 = vadd.f32 %v295_v6, %v294_v30 }
  0xa7   :  { %v257_v1 = vmul.f32 %v231_v2, %v201_v5  ;;  %v265_v44 = vadd.f32 %v241_v52, %v233_v50  ;;  %v312_v3 = vadd.f32 %v311_v22, %v262_v41  ;;  %v305_v45 = vadd.f32 %v304_v26, %v303_v35 }
  0xa8   :  { %v279_v4 = vrot.slane %v278_v63, 2  ;;  %v288_v13 = vrot.slane %v287_v60, 2  ;;  %v321_v46 = vadd.f32 %v320_v23, %v263_v18  ;;  %v297_v48 = vrot.slane %v296_v24, 2 }
  0xa9   :  { %v266_v47 = vadd.f32 %v265_v44, %v249_v62  ;;  %v313_v49 = vrot.slane %v312_v3, 4  ;;  %v330_v36 = vadd.f32 %v329_v59, %v264_v20  ;;  %v306_v53 = vrot.slane %v305_v45, 2 }
  0xaa   :  { %v280_v57 = vadd.f32 %v279_v4, %v278_v63  ;;  %v289_v33 = vadd.f32 %v288_v13, %v287_v60  ;;  %v322_v14 = vrot.slane %v321_v46, 4  ;;  %v298_v54 = vadd.f32 %v297_v48, %v296_v24 }
  0xab   :  { %v267_v43 = vadd.f32 %v266_v47, %v257_v1  ;;  %v314_v15 = vadd.f32 %v313_v49, %v312_v3  ;;  %v331_v55 = vrot.slane %v330_v36, 4  ;;  %v307_v39 = vadd.f32 %v306_v53, %v305_v45 }
  0xac   :  { %v290_v2 = vrot.slane %v289_v33, 1  ;;  %v323_v40 = vadd.f32 %v322_v14, %v321_v46  ;;  %v456_v17 = vmov 1966171168   ;;  %v299_v18 = vrot.slane %v298_v54, 1 }
  0xad   :  { %v368_v41 = vunpack.c.l.s4 %v456_v17  ;;  %v268_v19 = vrot.slane %v267_v43, 4  ;;  %v315_v9 = vrot.slane %v314_v15, 2  ;;  %v332_v31 = vadd.f32 %v331_v55, %v330_v36 }
  0xae   :  { %v281_v42 = vrot.slane %v280_v57, 1  ;;  %v291_v10 = vadd.f32 %v290_v2, %v289_v33  ;;  %v308_v11 = vrot.slane %v307_v39, 1  ;;  %v324_v12 = vrot.slane %v323_v40, 2 }
  0xaf   :  { %v269_v20 = vadd.f32 %v268_v19, %v267_v43  ;;  %v300_v56 = vadd.f32 %v299_v18, %v298_v54  ;;  %v316_v21 = vadd.f32 %v315_v9, %v314_v15  ;;  %v333_v22 = vrot.slane %v332_v31, 2 }
  0xb0   :  { %v346_v23 = vrot.slane %v341_v7, %v51_v25  ;;  %v309_v37 = vadd.f32 %v308_v11, %v307_v39  ;;  %v325_v38 = vadd.f32 %v324_v12, %v323_v40  ;;  %v369_v8 = vunpack.c.0.s8 %v368_v41 }
  0xb1   :  { %v270_v58 = vrot.slane %v269_v20, 2  ;;  %v317_v59 = vrot.slane %v316_v21, 1  ;;  %v334_v0 = vadd.f32 %v333_v22, %v332_v31  ;;  %v282_v27 = vadd.f32 %v281_v42, %v280_v57 }
  0xb2   :  { %v326_v51 = vrot.slane %v325_v38, 1  ;;  %v349_v28 = vadd.f32 %v346_v23, %v291_v10  ;;  %v350_v29 = vadd.f32 %v346_v23, %v300_v56  ;;  %v351_v34 = vadd.f32 %v346_v23, %v309_v37 }
  0xb3   :  { %v271_v30 = vadd.f32 %v270_v58, %v269_v20  ;;  %v318_v32 = vadd.f32 %v317_v59, %v316_v21  ;;  %v335_v61 = vrot.slane %v334_v0, 1  ;;  %v372_v25 = vsub.s32 %v369_v8, %v527_v16 }
  0xb4   :  { %v327_v35 = vadd.f32 %v326_v51, %v325_v38  ;;  %v348_v6 = vadd.f32 %v346_v23, %v282_v27  ;;  %v364_v26 = vcombine.low %v349_v28, %v350_v29 }
  0xb5   :  { %v272_v5 = vrot.slane %v271_v30, 1  ;;  %v336_v50 = vadd.f32 %v335_v61, %v334_v0  ;;  %v352_v52 = vadd.f32 %v346_v23, %v318_v32 }
  0xb6   :  { %v353_v62 = vadd.f32 %v346_v23, %v327_v35  ;;  %v380_v13 = vrot.slane %v364_v26, %v372_v25 }
  0xb7   :  { %v273_v63 = vadd.f32 %v272_v5, %v271_v30  ;;  %v354_v60 = vadd.f32 %v346_v23, %v336_v50  ;;  %v365_v1 = vcombine.low %v351_v34, %v352_v52 }
  0xb9   :  { %v347_v44 = vadd.f32 %v346_v23, %v273_v63  ;;  %v366_v24 = vcombine.low %v353_v62, %v354_v60  ;;  %v387_v3 = vrot.slane %v365_v1, %v372_v25 }
  0xbb   :  { %v363_v4 = vcombine.low %v347_v44, %v348_v6  ;;  %v394_v45 = vrot.slane %v366_v24, %v372_v25 }
  0xbd   :  { %v373_v46 = vrot.slane %v363_v4, %v372_v25  ;;  %v396_v47 = vcombine.low %v387_v3, %v394_v45 }
  0xbf   :  { %v395_v48 = vcombine.low %v373_v46, %v380_v13  ;;  %v410_v49 = vrot.slane %v396_v47, %v372_v25 }
  0xc1   :  { %v403_v36 = vrot.slane %v395_v48, %v372_v25 }
  0xc3   :  { %v411_v16 = vcombine.low %v403_v36, %v410_v49 }
  0xc5   :  { %413 = vst [vmem:[#allocation3] sm:$0xff] %v411_v16 }
  0xc6   :  { %444 = shalt.err (!%p441_p4)
}
  0xc7   :  { %423 = dma.vmem_to_hbm [thread:$0]  %s421_s17, 128, %s684_s5, [#allocation4]  }
  0xc8   :  { %453 = dma.done.wait [#allocation4], 128  }
  0xc9   :  { %454 = vsyncadd [#allocation4], 4294967168 }
  0xca   :  { %427 = vsyncpa [#allocation4], 1 }

</bundles_post_ra>
